<compile_context>
chip_gen: v7x
topology: tpu7x:2x2x1
jax: 0.10.0
libtpu: 0.0.40
codegen_flags: <defaults>
</compile_context>

<pallas_src>
import functools

import jax
import jax.numpy as jnp
from jax.experimental import pallas as pl
from jax.experimental.pallas import tpu as pltpu


def _round_up(x: int, m: int) -> int:
    return ((x + m - 1) // m) * m


def _num_tensorcores_per_chip() -> int:
    """2 on v7x (grid must keep >= 2 steps for both TCs), else 1."""
    try:
        kind = jax.devices()[0].device_kind.lower()
        if "v7" in kind:
            return 2
    except Exception:
        pass
    return 1


def _vmem_bytes_per_core() -> int:
    """Physical VMEM per core; conservative 64 MiB (v7x) fallback."""
    try:
        info = pltpu.get_tpu_info()
        v = int(getattr(info, "vmem_capacity_bytes", 0))
        if v > 0:
            return v
    except Exception:
        pass
    return 64 * 1024 * 1024


def _pick_batch_tile(n: int, *, per_batch_vmem: int, l_tile: int,
                     vmem_budget: int, target_rows: int, num_cores: int) -> int:
    """Largest divisor of n such that (a) bt*L_tile ~ target_rows (per-step
    overhead amortized), (b) the per-step VMEM estimate fits the budget and
    (c) on 2-TC chips at least num_cores grid steps remain."""
    bt_rows = max(1, target_rows // max(1, l_tile))
    bt_vmem = max(1, vmem_budget // max(1, per_batch_vmem))
    bt = max(1, min(n, bt_rows, bt_vmem))
    if num_cores >= 2 and n >= num_cores:
        bt = min(bt, n // num_cores)          # keep both v7x TensorCores busy
    while n % bt:
        bt -= 1
    return bt


# --------------------------------------------------------------------------- #
# Kernel bodies
# --------------------------------------------------------------------------- #
def _conv_kernel_packed(xs_ref, xn_ref, w_ref, b_ref, o_ref):
    """Small-C_in path: LHS already im2col'd (lane-dense) by the wrapper.

    xs_ref, xn_ref : (bt, L_tile, K_max*C_in)  bf16   VMEM
    w_ref          : (K_max*C_in, C_pad)       bf16   VMEM (grid-invariant)
    b_ref          : (1, C_pad)                f32    VMEM (grid-invariant)
    o_ref          : (bt, L_tile, C_pad)       bf16   VMEM
    """
    bt, lt, kc = xs_ref.shape
    c_pad = w_ref.shape[1]
    w = w_ref[...]
    b = b_ref[...]

    def branch(ref):
        acc = jnp.dot(ref[...].reshape(bt * lt, kc), w,
                      preferred_element_type=jnp.float32)
        return jnp.maximum(acc + b, 0.0)            # bias + per-branch ReLU (f32)

    out = branch(xs_ref) + branch(xn_ref)           # static + non-static, shared W
    o_ref[...] = out.reshape(bt, lt, c_pad).astype(o_ref.dtype)


def _conv_kernel_taps(xs_ref, xn_ref, w_ref, b_ref, o_ref, *, K_max, L_tile):
    """Large-C_in path: per-tap accumulated matmuls against 3-D weight.

    xs_ref, xn_ref : (bt, L_pad, C_in)        bf16   VMEM
    w_ref          : (K_max, C_in, C_pad)     bf16   VMEM (grid-invariant)
    b_ref          : (1, C_pad)               f32    VMEM (grid-invariant)
    o_ref          : (bt, L_tile, C_pad)      bf16   VMEM
    """
    bt, _, c_in = xs_ref.shape
    c_pad = w_ref.shape[2]
    b = b_ref[...]
    wk = [w_ref[k] for k in range(K_max)]           # (C_in, C_pad) per tap

    def branch(ref):
        x = ref[...]                                 # (bt, L_pad, C_in)
        acc = jnp.dot(x[:, 0:L_tile, :].reshape(bt * L_tile, c_in), wk[0],
                      preferred_element_type=jnp.float32)
        for k in range(1, K_max):                    # per-tap accumulation, no im2col copies
            xk = x[:, k:k + L_tile, :].reshape(bt * L_tile, c_in)
            acc = acc + jnp.dot(xk, wk[k], preferred_element_type=jnp.float32)
        return jnp.maximum(acc + b, 0.0)             # bias + per-branch ReLU (f32)

    out = branch(xs_ref) + branch(xn_ref)            # static + non-static, shared W
    o_ref[...] = out.reshape(bt, L_tile, c_pad).astype(o_ref.dtype)


# --------------------------------------------------------------------------- #
# Wrapper
# --------------------------------------------------------------------------- #
@functools.partial(jax.jit, static_argnames=("kernel_sizes", "branch_out",
                                             "matmul_dtype", "store_dtype"))
def fused_multi_conv1d_dual_relu(static_ncl, nonstatic_ncl, w_pack, b_pack,
                                 kernel_sizes, branch_out,
                                 matmul_dtype=jnp.bfloat16,
                                 store_dtype=jnp.bfloat16):
    """relu(conv_K(static)) + relu(conv_K(non_static)) for every K, one kernel.

    static_ncl / nonstatic_ncl : (N, C_in, L)          (PyTorch NCL layout)
    w_pack                     : (K_max, C_in, C_pad)  tap-packed weights
    b_pack                     : (1, C_pad)            packed bias
    returns: tuple of (N, branch_out, L - K + 1), one per kernel size.
    """
    N, C_in, L = static_ncl.shape
    K_max, K_min = max(kernel_sizes), min(kernel_sizes)
    L_out = L - K_min + 1
    lhs_bytes = jnp.dtype(matmul_dtype).itemsize
    out_bytes = jnp.dtype(store_dtype).itemsize
    sub = 16 if lhs_bytes == 2 else 8
    L_tile = _round_up(L_out, sub)                # sublane-aligned output rows
    L_pad = L_tile + K_max - 1                    # deepest tap stays in bounds
    C_pad = w_pack.shape[2]
    out_dtype = static_ncl.dtype

    # Lane-densify the LHS only when C_in is tiny; keep (L, C_in) + per-tap
    # matmuls when C_in alone fills lanes / the MXU contraction dimension.
    use_im2col_lhs = (K_max * C_in) <= 128

    # Layout plumbing only (NCL->NLC, zero pad L, bf16 cast); compute is in-kernel.
    # TODO(synk): accept NLC activations from the embedding layer (and emit NLC)
    # to remove these wrapper-side transpose passes entirely.
    def prep(x):
        x = jnp.transpose(x, (0, 2, 1))                           # (N, L, C_in)
        x = jnp.pad(x, ((0, 0), (0, L_pad - L), (0, 0)))
        return x.astype(matmul_dtype)

    xs, xn = prep(static_ncl), prep(nonstatic_ncl)
    b2 = b_pack.astype(jnp.float32)

    if use_im2col_lhs:
        KC = K_max * C_in

        def im2col(x):   # (N, L_pad, C_in) -> (N, L_tile, K_max*C_in), lane idx = k*C_in + c
            return jnp.concatenate(
                [x[:, k:k + L_tile, :] for k in range(K_max)], axis=-1)

        xs, xn = im2col(xs), im2col(xn)
        w = w_pack.reshape(KC, C_pad).astype(matmul_dtype)
        kernel = _conv_kernel_packed
        lhs_lanes, lhs_rows = KC, L_tile
        in_block = lambda bt: (bt, L_tile, KC)
        w_block, w_index = (KC, C_pad), (lambda n: (0, 0))
    else:
        w = w_pack.astype(matmul_dtype)
        kernel = functools.partial(_conv_kernel_taps, K_max=K_max, L_tile=L_tile)
        lhs_lanes, lhs_rows = C_in, L_pad
        in_block = lambda bt: (bt, L_pad, C_in)
        w_block, w_index = (K_max, C_in, C_pad), (lambda n: (0, 0, 0))

    # --- Tile sizing: big batch tile, bounded by an explicit VMEM budget. ----
    num_cores = _num_tensorcores_per_chip()
    vmem_limit = int(0.75 * _vmem_bytes_per_core())   # explicit, > scoped default
    vmem_budget = int(0.7 * vmem_limit)               # ~30% headroom

    lane_lhs = _round_up(lhs_lanes, 128)              # VMEM lane padding
    per_batch_vmem = (
        2 * 2 * _round_up(lhs_rows, sub) * lane_lhs * lhs_bytes     # 2 branches x 2 bufs
        + 2 * _round_up(L_tile, sub) * C_pad * out_bytes            # output, 2 bufs
        + 4 * L_tile * C_pad * 4                                    # f32 accs / epilogue temps
    )
    bt = _pick_batch_tile(N, per_batch_vmem=per_batch_vmem, l_tile=L_tile,
                          vmem_budget=vmem_budget, target_rows=4096,
                          num_cores=num_cores)

    packed = pl.pallas_call(
        kernel,
        out_shape=jax.ShapeDtypeStruct((N, L_tile, C_pad), store_dtype),
        grid_spec=pltpu.PrefetchScalarGridSpec(
            num_scalar_prefetch=0,
            grid=(N // bt,),
            in_specs=[
                pl.BlockSpec(in_block(bt), lambda n: (n, 0, 0)),
                pl.BlockSpec(in_block(bt), lambda n: (n, 0, 0)),
                # Grid-invariant weight/bias: constant block index -> fetched
                # once, kept resident across steps (no per-step re-DMA).
                pl.BlockSpec(w_block, w_index),
                pl.BlockSpec((1, C_pad), lambda n: (0, 0)),
            ],
            out_specs=pl.BlockSpec((bt, L_tile, C_pad), lambda n: (n, 0, 0)),
        ),
        compiler_params=pltpu.CompilerParams(
            dimension_semantics=("parallel",),
            vmem_limit_bytes=vmem_limit),
    )(xs, xn, w, b2)

    # Slice off padded rows/lanes and restore PyTorch's (N, C_out, L_out) layout.
    outs = []
    for j, K in enumerate(kernel_sizes):
        valid = L - K + 1
        o = packed[:, :valid, j * branch_out:(j + 1) * branch_out]  # (N, valid, bo)
        outs.append(jnp.transpose(o, (0, 2, 1)).astype(out_dtype))  # (N, bo, valid)
    return tuple(outs)


class ConvolutionLayer:
    """JAX/Pallas port of senCNN ConvolutionLayer (deterministic synthetic init)."""

    KERNEL_SIZES = (3, 4, 5)

    def __init__(self, in_channels: int, out_channels: int, key) -> None:
        # NOTE: like the PyTorch module, out_channels // 3 silently drops
        # channels when out_channels is not divisible by 3.
        self.in_channels = in_channels
        self.branch_out = out_channels // 3
        ks = self.KERNEL_SIZES
        keys = jax.random.split(key, 2 * len(ks))
        self.params = []
        for i, k in enumerate(ks):
            # PyTorch Conv1d default init: U(-bound, bound), bound = 1/sqrt(C_in*K)
            bound = 1.0 / float(in_channels * k) ** 0.5
            w = jax.random.uniform(
                keys[2 * i], (self.branch_out, in_channels, k),
                minval=-bound, maxval=bound, dtype=jnp.float32)
            b = jax.random.uniform(
                keys[2 * i + 1], (self.branch_out,),
                minval=-bound, maxval=bound, dtype=jnp.float32)
            self.params.append((w, b))

        # Pack all three branches ONCE (hoisted out of the forward pass):
        # w_pack[k, c, j*bo + o] = w_j[o, c, k] for k < K_j, zero otherwise.
        # Lanes padded to a multiple of 128 so kernel stores are lane-dense;
        # pad lanes keep zero weight AND zero bias so they stay exactly 0.
        K_max = max(ks)
        c_tot = self.branch_out * len(ks)
        c_pad = _round_up(max(c_tot, 1), 128)
        w_pack = jnp.zeros((K_max, in_channels, c_pad), jnp.float32)
        b_pack = jnp.zeros((c_pad,), jnp.float32)
        for j, (w, b) in enumerate(self.params):
            kj = w.shape[2]
            lo, hi = j * self.branch_out, (j + 1) * self.branch_out
            w_pack = w_pack.at[:kj, :, lo:hi].set(jnp.transpose(w, (2, 1, 0)))
            b_pack = b_pack.at[lo:hi].set(b)
        self.w_pack = w_pack                       # (K_max, C_in, C_pad)
        self.b_pack = b_pack.reshape(1, c_pad)     # (1, C_pad)

    def __call__(self, x):
        static, non_static = x
        return fused_multi_conv1d_dual_relu(
            static, non_static, self.w_pack, self.b_pack,
            kernel_sizes=self.KERNEL_SIZES, branch_out=self.branch_out)


def _reference(static, non_static, w, b, matmul_dtype=jnp.bfloat16):
    """Plain-JAX reference using the kernel's operand rounding (bf16 in, f32 acc)."""
    w32 = w.astype(matmul_dtype).astype(jnp.float32)

    def conv(x):
        x32 = x.astype(matmul_dtype).astype(jnp.float32)
        y = jax.lax.conv_general_dilated(
            x32, w32, window_strides=(1,), padding="VALID",
            dimension_numbers=("NCH", "OIH", "NCH"),
            precision=jax.lax.Precision.HIGHEST)
        return y + b[None, :, None]

    return jnp.maximum(conv(static), 0.0) + jnp.maximum(conv(non_static), 0.0)


if __name__ == "__main__":
    key = jax.random.PRNGKey(0)

    # Config 1 exercises the lane-dense im2col-LHS path (tiny C_in),
    # config 2 exercises the per-tap accumulated-matmul path (K_max*C_in > 128).
    configs = [
        (2, 8, 12, 16),    # (batch, in_channels, out_channels, seq)
        (2, 64, 12, 16),
    ]
    for cfg_i, (batch, in_channels, out_channels, seq) in enumerate(configs):
        k_layer, k_s, k_n, key = jax.random.split(key, 4)
        layer = ConvolutionLayer(in_channels, out_channels, k_layer)

        static = jax.random.normal(k_s, (batch, in_channels, seq), dtype=jnp.float32)
        non_static = jax.random.normal(k_n, (batch, in_channels, seq), dtype=jnp.float32)

        tri, tetra, penta = layer((static, non_static))
        jax.block_until_ready((tri, tetra, penta))

        # Correctness check vs. a plain-JAX conv reference (same bf16 operands).
        # The kernel stores bf16 (writeback-bandwidth optimization), so allow one
        # extra bf16 rounding vs. the f32 reference.
        for out, (w, b) in zip((tri, tetra, penta), layer.params):
            ref = _reference(static, non_static, w, b)
            assert out.shape == ref.shape, (cfg_i, out.shape, ref.shape)
            assert jnp.allclose(out, ref, atol=2e-2, rtol=2e-2), \
                (cfg_i, float(jnp.max(jnp.abs(out - ref))))

    print("KERNEL_OK")
</pallas_src>

<mosaic_0001>
module attributes {stable_mosaic.version = 11 : i64} {
  func.func @_conv_kernel_packed(%arg0: i32, %arg1: memref<2x16x40xbf16, #tpu.memory_space<vmem>>, %arg2: memref<2x16x40xbf16, #tpu.memory_space<vmem>>, %arg3: memref<40x128xbf16, #tpu.memory_space<vmem>>, %arg4: memref<1x128xf32, #tpu.memory_space<vmem>>, %arg5: memref<2x16x128xbf16, #tpu.memory_space<vmem>>) attributes {dimension_semantics = [#tpu.dimension_semantics<parallel>], iteration_bounds = array<i64: 1>, scalar_prefetch = 0 : i64, scratch_operands = 0 : i64, tpu.core_type = #tpu.core_type<tc>, window_params = [{transform_indices = @transform_0, window_bounds = array<i64: 2, 16, 40>}, {transform_indices = @transform_1, window_bounds = array<i64: 2, 16, 40>}, {pipeline_mode = #tpu.pipeline_mode<synchronous>, transform_indices = @transform_2, window_bounds = array<i64: 40, 128>}, {pipeline_mode = #tpu.pipeline_mode<synchronous>, transform_indices = @transform_3, window_bounds = array<i64: 1, 128>}, {transform_indices = @transform_4, window_bounds = array<i64: 2, 16, 128>}]} {
    %c0 = arith.constant 0 : index
    %c0_0 = arith.constant 0 : index
    %0 = vector.load %arg3[%c0, %c0_0] : memref<40x128xbf16, #tpu.memory_space<vmem>>, vector<40x128xbf16>
    %c0_1 = arith.constant 0 : index
    %c0_2 = arith.constant 0 : index
    %1 = vector.load %arg4[%c0_1, %c0_2] : memref<1x128xf32, #tpu.memory_space<vmem>>, vector<1x128xf32>
    %c0_3 = arith.constant 0 : index
    %c0_4 = arith.constant 0 : index
    %c0_5 = arith.constant 0 : index
    %2 = vector.load %arg1[%c0_3, %c0_4, %c0_5] : memref<2x16x40xbf16, #tpu.memory_space<vmem>>, vector<2x16x40xbf16>
    %3 = vector.shape_cast %2 : vector<2x16x40xbf16> to vector<32x40xbf16>
    %cst = arith.constant dense<0.000000e+00> : vector<32x128xf32>
    %4 = tpu.matmul %3, %0, %cst {dimension_numbers = #tpu.dot_dimension_numbers<[1], [0], [0], [1], [0, 0, 1, 1], [], []>} : vector<32x40xbf16>, vector<40x128xbf16>, vector<32x128xf32> -> vector<32x128xf32>
    %5 = vector.broadcast %1 : vector<1x128xf32> to vector<32x128xf32>
    %6 = arith.addf %4, %5 : vector<32x128xf32>
    %cst_6 = arith.constant 0.000000e+00 : f32
    %7 = vector.broadcast %cst_6 : f32 to vector<32x128xf32>
    %8 = arith.maximumf %6, %7 : vector<32x128xf32>
    %c0_7 = arith.constant 0 : index
    %c0_8 = arith.constant 0 : index
    %c0_9 = arith.constant 0 : index
    %9 = vector.load %arg2[%c0_7, %c0_8, %c0_9] : memref<2x16x40xbf16, #tpu.memory_space<vmem>>, vector<2x16x40xbf16>
    %10 = vector.shape_cast %9 : vector<2x16x40xbf16> to vector<32x40xbf16>
    %cst_10 = arith.constant dense<0.000000e+00> : vector<32x128xf32>
    %11 = tpu.matmul %10, %0, %cst_10 {dimension_numbers = #tpu.dot_dimension_numbers<[1], [0], [0], [1], [0, 0, 1, 1], [], []>} : vector<32x40xbf16>, vector<40x128xbf16>, vector<32x128xf32> -> vector<32x128xf32>
    %12 = vector.broadcast %1 : vector<1x128xf32> to vector<32x128xf32>
    %13 = arith.addf %11, %12 : vector<32x128xf32>
    %cst_11 = arith.constant 0.000000e+00 : f32
    %14 = vector.broadcast %cst_11 : f32 to vector<32x128xf32>
    %15 = arith.maximumf %13, %14 : vector<32x128xf32>
    %16 = arith.addf %8, %15 : vector<32x128xf32>
    %17 = vector.shape_cast %16 : vector<32x128xf32> to vector<2x16x128xf32>
    %18 = arith.truncf %17 : vector<2x16x128xf32> to vector<2x16x128xbf16>
    %c0_12 = arith.constant 0 : index
    %c0_13 = arith.constant 0 : index
    %c0_14 = arith.constant 0 : index
    %19 = vector.load %arg5[%c0_12, %c0_13, %c0_14] : memref<2x16x128xbf16, #tpu.memory_space<vmem>>, vector<2x16x128xbf16>
    tpu.vector_store %arg5[%c0_12, %c0_13, %c0_14], %18 {strides = array<i32>} : memref<2x16x128xbf16, #tpu.memory_space<vmem>>, vector<2x16x128xbf16>,
    return
  }
  func.func @transform_0(%arg0: i32) -> (i32, i32, i32) {
    %c0_i32 = arith.constant 0 : i32
    %c0_i32_0 = arith.constant 0 : i32
    %c0_i32_1 = arith.constant 0 : i32
    return %arg0, %c0_i32, %c0_i32_0 : i32, i32, i32
  }
  func.func @transform_1(%arg0: i32) -> (i32, i32, i32) {
    %c0_i32 = arith.constant 0 : i32
    %c0_i32_0 = arith.constant 0 : i32
    %c0_i32_1 = arith.constant 0 : i32
    return %arg0, %c0_i32, %c0_i32_0 : i32, i32, i32
  }
  func.func @transform_2(%arg0: i32) -> (i32, i32) {
    %c0_i32 = arith.constant 0 : i32
    %c0_i32_0 = arith.constant 0 : i32
    %c0_i32_1 = arith.constant 0 : i32
    return %c0_i32, %c0_i32_0 : i32, i32
  }
  func.func @transform_3(%arg0: i32) -> (i32, i32) {
    %c0_i32 = arith.constant 0 : i32
    %c0_i32_0 = arith.constant 0 : i32
    %c0_i32_1 = arith.constant 0 : i32
    return %c0_i32, %c0_i32_0 : i32, i32
  }
  func.func @transform_4(%arg0: i32) -> (i32, i32, i32) {
    %c0_i32 = arith.constant 0 : i32
    %c0_i32_0 = arith.constant 0 : i32
    %c0_i32_1 = arith.constant 0 : i32
    return %arg0, %c0_i32, %c0_i32_0 : i32, i32, i32
  }
}

</mosaic_0001>

<bundles_post_ra>
// kernel: fused_multi_conv1d_dual_relu.1
= control target key start
LH: loop header
LB: loop body
LE: loop exit
PB: predicated region body
PF: predicated region fallthrough
CT: control target
= control target key end

     0   :  { %vm59_vm0 = vcmask 326656   ;;  %vm66_vm1 = vcmask 1043456   ;;  %s353_s2 = inlined_call_operand.vmem [shape: bf16[40,128], index: 2, kind: input, shape index: {}]   ;;  %s354_s0 = inlined_call_operand.vmem [shape: bf16[2,16,40], index: 0, kind: input, shape index: {}]   ;;  %s355_s1 = inlined_call_operand.vmem [shape: bf16[2,16,40], index: 1, kind: input, shape index: {}]   ;;  %s356_s3 = inlined_call_operand.vmem [shape: f32[1,128], index: 3, kind: input, shape index: {}]   ;;  %s357_s4 = inlined_call_operand.vmem [shape: bf16[2,16,128], index: 4, kind: output, shape index: {}]  }
   0x1   :  { %v287_v0 = vld [vmem:[%s353_s2] sm:$0xff]   ;;  %v288_v1 = vld [vmem:[%s353_s2 + $0x8] sm:$0xff]   ;;  %v289_v2 = vld [vmem:[%s353_s2 + $0x10] ss:$0 sps:$4 sm:$0xff]  }
   0x2   :  { %265 = vmatprep.subr.bf16.mxu0 %v287_v0  ;;  %275 = vmatprep.subr.bf16.mxu1 %v287_v0  ;;  %v290_v3 = vld [vmem:[%s354_s0] sm:$0xff]   ;;  %v68_v5 = vsel %vm66_vm1, %v289_v2, 0  ;;  %v292_v6 = vld [vmem:[%s354_s0 + $0x8] sm:$0xff]  }
   0x3   :  { %266 = vmatpush3.bf16.msra.mxu0 %v287_v0  ;;  %276 = vmatpush3.bf16.msra.mxu1 %v287_v0  ;;  %v291_v4 = vld [vmem:[%s355_s1] sm:$0xff]   ;;  %v293_v7 = vld [vmem:[%s355_s1 + $0x8] sm:$0xff]  }
   0x4   :  { %267 = vmatprep.subr.bf16.mxu0 %v288_v1  ;;  %277 = vmatprep.subr.bf16.mxu1 %v288_v1  ;;  %v224_v8 = vld [vmem:[%s356_s3] ss:$0 sm:$0xff] }
   0x5   :  { %271 = vmatprep.mubr.msk.bf16.mxu0 %vm59_vm0, %v290_v3  ;;  %281 = vmatprep.mubr.msk.bf16.mxu1 %vm59_vm0, %v291_v4 }
   0x7   :  { %268 = vmatpush3.bf16.msra.mxu0 %v288_v1  ;;  %278 = vmatpush3.bf16.msra.mxu1 %v288_v1 }
   0x8   :  { %285 = vmatprep.subr.msk.bf16.mxu0 %vm66_vm1, %v289_v2  ;;  %286 = vmatprep.subr.msk.bf16.mxu1 %vm66_vm1, %v289_v2 }
   0xb   :  { %270 = vmatpush3.bf16.msra.mxu0 %v68_v5  ;;  %280 = vmatpush3.bf16.msra.mxu1 %v68_v5 }
   0xe   :  { %272 = vmatmul.mubr.msk.bf16.vlgmr.msra.gmra.mrb[0].mxu0 %vm59_vm0, %v292_v6  ;;  %282 = vmatmul.mubr.msk.bf16.vlgmr.msra.gmra.mrb[0].mxu1 %vm59_vm0, %v293_v7 }
  0xe1   :  { %v273_v9 = vpop.f32.mrb[0].mxu0  ;;  %v283_v10 = vpop.f32.mrb[0].mxu1 }
  0xe2   :  { %v113_v11 = vadd.f32 %v273_v9, %v224_v8  ;;  %v186_v12 = vadd.f32 %v283_v10, %v224_v8  ;;  %v104_v13 = vpop.f32.mrb[1].mxu0  ;;  %v177_v14 = vpop.f32.mrb[1].mxu1 }
  0xe3   :  { %v105_v15 = vadd.f32 %v224_v8, %v104_v13  ;;  %v178_v16 = vadd.f32 %v224_v8, %v177_v14  ;;  %v274_v17 = vpop.f32.mrb[2].mxu0  ;;  %v284_v18 = vpop.f32.mrb[2].mxu1 }
  0xe4   :  { %v121_v19 = vmax.f32 %v113_v11, 0.0  ;;  %v194_v20 = vmax.f32 %v186_v12, 0.0  ;;  %v116_v21 = vadd.f32 %v274_v17, %v224_v8  ;;  %v189_v22 = vadd.f32 %v284_v18, %v224_v8  ;;  %v107_v23 = vpop.f32.mrb[3].mxu0  ;;  %v180_v24 = vpop.f32.mrb[3].mxu1 }
  0xe5   :  { %v119_v25 = vmax.f32 %v105_v15, 0.0  ;;  %v192_v26 = vmax.f32 %v178_v16, 0.0  ;;  %v108_v27 = vadd.f32 %v224_v8, %v107_v23  ;;  %v181_v28 = vadd.f32 %v224_v8, %v180_v24 }
  0xe6   :  { %v198_v29 = vadd.f32 %v194_v20, %v121_v19  ;;  %v122_v30 = vmax.f32 %v116_v21, 0.0  ;;  %v195_v31 = vmax.f32 %v189_v22, 0.0 }
  0xe7   :  { %v196_v32 = vadd.f32 %v192_v26, %v119_v25  ;;  %v120_v33 = vmax.f32 %v108_v27, 0.0  ;;  %v193_v34 = vmax.f32 %v181_v28, 0.0 }
  0xe8   :  { %v199_v35 = vadd.f32 %v195_v31, %v122_v30 }
  0xe9   :  { %v197_v36 = vadd.f32 %v193_v34, %v120_v33 }
  0xea   :  { %v252_v37 = vpack.c.bf16 %v199_v35, %v198_v29 }
  0xeb   :  { %v247_v38 = vpack.c.bf16 %v197_v36, %v196_v32 }
  0xec   :  { %254 = vst [vmem:[%s357_s4 + $0x8] sm:$0xff] %v252_v37  }
  0xed   :  { %248 = vst [vmem:[%s357_s4] sm:$0xff] %v247_v38  }

</bundles_post_ra>
